<compile_context>
chip_gen: v5e
topology: v5e:2x2
jax: 0.10.0
libtpu: 0.0.40
codegen_flags: <defaults>
</compile_context>

<pallas_src>
from functools import partial

import jax
import jax.numpy as jnp
from jax import lax
from jax.experimental import pallas as pl
from jax.experimental.pallas import tpu as pltpu


def resnet_block_kernel(x_ref, w1_ref, b1_ref, w2_ref, b2_ref, out_ref,
                        xpad1_ref, xpad2_ref):
    # x_ref    : (1, H, W*C)      merged lane-dense input (also used as the residual)
    # w1_ref   : (3, W*C, W*C)    block-banded conv1 weights (BN1 scale folded in)
    # b1_ref   : (1, W*C)         folded BN1 bias, tiled per output column
    # w2_ref   : (3, W*C, W*C)    block-banded conv2 weights (BN2 scale folded in)
    # b2_ref   : (1, W*C)         folded BN2 bias, tiled
    # out_ref  : (1, H, W*C)
    # xpad*_ref: VMEM (H+2, W*C) f32 row-padded activations (height halo) per conv
    H = x_ref.shape[1]
    WC = x_ref.shape[2]
    mxu_dtype = w1_ref.dtype

    x = x_ref[0].astype(jnp.float32)          # single HBM read; reused as residual below
    zrow = jnp.zeros((1, WC), jnp.float32)

    def conv3x3_bn(xpad_ref, act, w_ref, b_ref):
        # Rewrite the whole scratch every grid step (2 border rows + full-width interior):
        # cheap, and correct even when the batch grid is sharded across cores (no
        # program_id==0 init of persistent-but-uninitialized scratch).
        xpad_ref[0:1, :] = zrow
        xpad_ref[H + 1:H + 2, :] = zrow
        xpad_ref[1:H + 1, :] = act
        # Accumulator initialized with the folded BN bias (hoisted, one broadcast).
        acc = jnp.broadcast_to(b_ref[...], (H, WC)).astype(jnp.float32)
        for ky in range(3):                   # 3 lane-dense (H,W*C) x (W*C,W*C) matmuls
            acc = acc + jnp.dot(
                xpad_ref[ky:ky + H, :].astype(mxu_dtype), w_ref[ky],
                preferred_element_type=jnp.float32)
        return acc

    out1 = jnp.maximum(conv3x3_bn(xpad1_ref, x, w1_ref, b1_ref), 0.0)     # conv1+BN1+ReLU
    out2 = conv3x3_bn(xpad2_ref, out1, w2_ref, b2_ref) + x                # conv2+BN2+res
    out_ref[0] = jnp.maximum(out2, 0.0).astype(out_ref.dtype)             # final ReLU


def _banded_conv_weights(w_hwio, W):
    """Fold the kx taps and the width zero-padding of a 3x3/stride-1/pad-1 conv into
    block-banded matrices: returns (3, W*Cin, W*Cout) such that, in the merged
    (h, w*C + c) layout,  out[h] += x_rowpadded[h + ky] @ big[ky]  for ky in 0..2."""
    KH, KW, Cin, Cout = w_hwio.shape
    ic = jnp.arange(W)                         # input column (unpadded)
    oc = jnp.arange(W)                         # output column
    kx = jnp.arange(KW)
    # sel[kx, ic, oc] = 1  iff  ic == oc + kx - 1  (out-of-range taps drop out == zero pad)
    sel = (ic[None, :, None] == oc[None, None, :] + kx[:, None, None] - 1)
    sel = sel.astype(w_hwio.dtype)                              # (KW, W, W)
    big = jnp.einsum('kiw,ykcd->yicwd', sel, w_hwio)            # (KH, W, Cin, W, Cout)
    return big.reshape(KH, W * Cin, W * Cout)


@partial(jax.jit, static_argnames=("eps", "compute_dtype"))
def resnet_block(x_nchw, w1_oihw, g1, be1, m1, v1, w2_oihw, g2, be2, m2, v2,
                 eps=1e-5, compute_dtype=jnp.float32):
    """Fused ResnetBlock forward (stride=1, downsample=None, eval-mode BN).
    x_nchw: (N, C, H, W) float32 -> (N, C, H, W) float32."""
    N, C, H, W = x_nchw.shape
    assert w1_oihw.shape == (C, C, 3, 3) and w2_oihw.shape == (C, C, 3, 3), \
        "stride=1 & downsample=None => inplanes must equal planes"
    WC = W * C

    # Fold eval-mode BN into conv weights (scale) and a per-channel bias (host-side).
    s1 = g1 / jnp.sqrt(v1 + eps); b1 = be1 - m1 * s1
    s2 = g2 / jnp.sqrt(v2 + eps); b2 = be2 - m2 * s2
    w1f = jnp.transpose(w1_oihw * s1[:, None, None, None], (2, 3, 1, 0))   # -> HWIO
    w2f = jnp.transpose(w2_oihw * s2[:, None, None, None], (2, 3, 1, 0))
    big1 = _banded_conv_weights(w1f, W).astype(compute_dtype)              # (3, WC, WC)
    big2 = _banded_conv_weights(w2f, W).astype(compute_dtype)
    b1_row = jnp.tile(b1, W).reshape(1, WC).astype(jnp.float32)
    b2_row = jnp.tile(b2, W).reshape(1, WC).astype(jnp.float32)

    # NCHW -> NHWC -> merged (N, H, W*C): lane-dense last dim, single copy of the input.
    x_m = jnp.transpose(x_nchw, (0, 2, 3, 1)).reshape(N, H, WC).astype(compute_dtype)

    out_m = pl.pallas_call(
        resnet_block_kernel,
        out_shape=jax.ShapeDtypeStruct((N, H, WC), jnp.float32),
        grid_spec=pltpu.PrefetchScalarGridSpec(
            num_scalar_prefetch=0,
            grid=(N,),
            in_specs=[
                pl.BlockSpec((1, H, WC), lambda n: (n, 0, 0)),     # x (also residual)
                pl.BlockSpec((3, WC, WC), lambda n: (0, 0, 0)),    # banded conv1 weights
                pl.BlockSpec((1, WC), lambda n: (0, 0)),           # BN1 bias row
                pl.BlockSpec((3, WC, WC), lambda n: (0, 0, 0)),    # banded conv2 weights
                pl.BlockSpec((1, WC), lambda n: (0, 0)),           # BN2 bias row
            ],
            out_specs=pl.BlockSpec((1, H, WC), lambda n: (n, 0, 0)),
            scratch_shapes=[pltpu.VMEM((H + 2, WC), jnp.float32),
                            pltpu.VMEM((H + 2, WC), jnp.float32)],
        ),
        compiler_params=pltpu.CompilerParams(
            dimension_semantics=("parallel",),
            vmem_limit_bytes=32 * 1024 * 1024,
        ),
    )(x_m, big1, b1_row, big2, b2_row)

    return jnp.transpose(out_m.reshape(N, H, W, C), (0, 3, 1, 2))   # back to NCHW


def _reference(x_nchw, w1_oihw, s1, b1, w2_oihw, s2, b2):
    """Pure-JAX reference (same math as the PyTorch forward with eval-mode BN)."""
    conv = lambda x, w: lax.conv_general_dilated(
        x, w, (1, 1), ((1, 1), (1, 1)),
        dimension_numbers=('NCHW', 'OIHW', 'NCHW'),
        precision=lax.Precision.HIGHEST)
    out = conv(x_nchw, w1_oihw) * s1.reshape(1, -1, 1, 1) + b1.reshape(1, -1, 1, 1)
    out = jnp.maximum(out, 0.0)
    out = conv(out, w2_oihw) * s2.reshape(1, -1, 1, 1) + b2.reshape(1, -1, 1, 1)
    return jnp.maximum(out + x_nchw, 0.0)


if __name__ == "__main__":
    # inplanes = planes = 8, stride = 1, downsample = None; W*C = 128 -> lane-dense.
    N, C, H, W = 2, 8, 16, 16
    key = jax.random.PRNGKey(0)
    ks = jax.random.split(key, 11)

    x = jax.random.normal(ks[0], (N, C, H, W), jnp.float32)
    w1 = jax.random.normal(ks[1], (C, C, 3, 3), jnp.float32) * 0.1       # OIHW, no bias
    w2 = jax.random.normal(ks[2], (C, C, 3, 3), jnp.float32) * 0.1
    g1 = 1.0 + 0.1 * jax.random.normal(ks[3], (C,), jnp.float32)
    be1 = 0.1 * jax.random.normal(ks[4], (C,), jnp.float32)
    m1 = 0.1 * jax.random.normal(ks[5], (C,), jnp.float32)
    v1 = 1.0 + 0.1 * jax.random.uniform(ks[6], (C,), jnp.float32)
    g2 = 1.0 + 0.1 * jax.random.normal(ks[7], (C,), jnp.float32)
    be2 = 0.1 * jax.random.normal(ks[8], (C,), jnp.float32)
    m2 = 0.1 * jax.random.normal(ks[9], (C,), jnp.float32)
    v2 = 1.0 + 0.1 * jax.random.uniform(ks[10], (C,), jnp.float32)

    # f32 path (v5e default: f32 elementwise, full-precision check).
    out = jax.block_until_ready(
        resnet_block(x, w1, g1, be1, m1, v1, w2, g2, be2, m2, v2))

    s1 = g1 / jnp.sqrt(v1 + 1e-5); b1 = be1 - m1 * s1
    s2 = g2 / jnp.sqrt(v2 + 1e-5); b2 = be2 - m2 * s2
    ref = _reference(x, w1, s1, b1, w2, s2, b2)
    assert out.shape == (N, C, H, W)
    assert jnp.allclose(out, ref, atol=5e-4, rtol=5e-4), "mismatch vs reference (f32)"

    # bf16 data path (v6e/v7x): bf16 x / weights fed to the MXU, f32 accumulation.
    out_bf16 = jax.block_until_ready(
        resnet_block(x, w1, g1, be1, m1, v1, w2, g2, be2, m2, v2,
                     compute_dtype=jnp.bfloat16))
    assert float(jnp.max(jnp.abs(out_bf16 - ref))) < 0.5, "bf16 path diverged"

    print("KERNEL_OK")
</pallas_src>

<mosaic_0001>
module attributes {stable_mosaic.version = 11 : i64} {
  func.func @resnet_block_kernel(%arg0: i32, %arg1: memref<1x16x128xf32, #tpu.memory_space<vmem>>, %arg2: memref<3x128x128xf32, #tpu.memory_space<vmem>>, %arg3: memref<1x128xf32, #tpu.memory_space<vmem>>, %arg4: memref<3x128x128xf32, #tpu.memory_space<vmem>>, %arg5: memref<1x128xf32, #tpu.memory_space<vmem>>, %arg6: memref<1x16x128xf32, #tpu.memory_space<vmem>>, %arg7: memref<18x128xf32, #tpu.memory_space<vmem>>, %arg8: memref<18x128xf32, #tpu.memory_space<vmem>>) attributes {dimension_semantics = [#tpu.dimension_semantics<parallel>], iteration_bounds = array<i64: 2>, scalar_prefetch = 0 : i64, scratch_operands = 2 : i64, tpu.core_type = #tpu.core_type<tc>, window_params = [{transform_indices = @transform_0, window_bounds = array<i64: 1, 16, 128>}, {pipeline_mode = #tpu.pipeline_mode<synchronous>, transform_indices = @transform_1, window_bounds = array<i64: 3, 128, 128>}, {pipeline_mode = #tpu.pipeline_mode<synchronous>, transform_indices = @transform_2, window_bounds = array<i64: 1, 128>}, {pipeline_mode = #tpu.pipeline_mode<synchronous>, transform_indices = @transform_3, window_bounds = array<i64: 3, 128, 128>}, {pipeline_mode = #tpu.pipeline_mode<synchronous>, transform_indices = @transform_4, window_bounds = array<i64: 1, 128>}, {transform_indices = @transform_5, window_bounds = array<i64: 1, 16, 128>}]} {
    %c0 = arith.constant 0 : index
    %c0_0 = arith.constant 0 : index
    %c0_1 = arith.constant 0 : index
    %0 = vector.load %arg1[%c0, %c0_0, %c0_1] : memref<1x16x128xf32, #tpu.memory_space<vmem>>, vector<1x16x128xf32>
    %1 = vector.shape_cast %0 : vector<1x16x128xf32> to vector<16x128xf32>
    %cst = arith.constant 0.000000e+00 : f32
    %2 = vector.broadcast %cst : f32 to vector<1x128xf32>
    %c0_2 = arith.constant 0 : index
    %c0_3 = arith.constant 0 : index
    %3 = vector.load %arg7[%c0_2, %c0_3] : memref<18x128xf32, #tpu.memory_space<vmem>>, vector<1x128xf32>
    tpu.vector_store %arg7[%c0_2, %c0_3], %2 {strides = array<i32>} : memref<18x128xf32, #tpu.memory_space<vmem>>, vector<1x128xf32>,
    %c17 = arith.constant 17 : index
    %c0_4 = arith.constant 0 : index
    %4 = vector.load %arg7[%c17, %c0_4] : memref<18x128xf32, #tpu.memory_space<vmem>>, vector<1x128xf32>
    tpu.vector_store %arg7[%c17, %c0_4], %2 {strides = array<i32>} : memref<18x128xf32, #tpu.memory_space<vmem>>, vector<1x128xf32>,
    %c1 = arith.constant 1 : index
    %c0_5 = arith.constant 0 : index
    %5 = vector.load %arg7[%c1, %c0_5] : memref<18x128xf32, #tpu.memory_space<vmem>>, vector<16x128xf32>
    tpu.vector_store %arg7[%c1, %c0_5], %1 {strides = array<i32>} : memref<18x128xf32, #tpu.memory_space<vmem>>, vector<16x128xf32>,
    %c0_6 = arith.constant 0 : index
    %c0_7 = arith.constant 0 : index
    %6 = vector.load %arg3[%c0_6, %c0_7] : memref<1x128xf32, #tpu.memory_space<vmem>>, vector<1x128xf32>
    %7 = vector.shape_cast %6 : vector<1x128xf32> to vector<1x128xf32>
    %8 = vector.broadcast %7 : vector<1x128xf32> to vector<16x128xf32>
    %c0_8 = arith.constant 0 : index
    %c0_9 = arith.constant 0 : index
    %9 = vector.load %arg7[%c0_8, %c0_9] : memref<18x128xf32, #tpu.memory_space<vmem>>, vector<16x128xf32>
    %c0_10 = arith.constant 0 : index
    %c0_11 = arith.constant 0 : index
    %c0_12 = arith.constant 0 : index
    %10 = vector.load %arg2[%c0_10, %c0_11, %c0_12] : memref<3x128x128xf32, #tpu.memory_space<vmem>>, vector<1x128x128xf32>
    %11 = vector.shape_cast %10 : vector<1x128x128xf32> to vector<128x128xf32>
    %cst_13 = arith.constant dense<0.000000e+00> : vector<16x128xf32>
    %12 = tpu.matmul %9, %11, %cst_13 {dimension_numbers = #tpu.dot_dimension_numbers<[1], [0], [0], [1], [0, 0, 1, 1], [], []>} : vector<16x128xf32>, vector<128x128xf32>, vector<16x128xf32> -> vector<16x128xf32>
    %13 = arith.addf %8, %12 : vector<16x128xf32>
    %c1_14 = arith.constant 1 : index
    %c0_15 = arith.constant 0 : index
    %14 = vector.load %arg7[%c1_14, %c0_15] : memref<18x128xf32, #tpu.memory_space<vmem>>, vector<16x128xf32>
    %c1_16 = arith.constant 1 : index
    %c0_17 = arith.constant 0 : index
    %c0_18 = arith.constant 0 : index
    %15 = vector.load %arg2[%c1_16, %c0_17, %c0_18] : memref<3x128x128xf32, #tpu.memory_space<vmem>>, vector<1x128x128xf32>
    %16 = vector.shape_cast %15 : vector<1x128x128xf32> to vector<128x128xf32>
    %cst_19 = arith.constant dense<0.000000e+00> : vector<16x128xf32>
    %17 = tpu.matmul %14, %16, %cst_19 {dimension_numbers = #tpu.dot_dimension_numbers<[1], [0], [0], [1], [0, 0, 1, 1], [], []>} : vector<16x128xf32>, vector<128x128xf32>, vector<16x128xf32> -> vector<16x128xf32>
    %18 = arith.addf %13, %17 : vector<16x128xf32>
    %c2 = arith.constant 2 : index
    %c0_20 = arith.constant 0 : index
    %19 = vector.load %arg7[%c2, %c0_20] : memref<18x128xf32, #tpu.memory_space<vmem>>, vector<16x128xf32>
    %c2_21 = arith.constant 2 : index
    %c0_22 = arith.constant 0 : index
    %c0_23 = arith.constant 0 : index
    %20 = vector.load %arg2[%c2_21, %c0_22, %c0_23] : memref<3x128x128xf32, #tpu.memory_space<vmem>>, vector<1x128x128xf32>
    %21 = vector.shape_cast %20 : vector<1x128x128xf32> to vector<128x128xf32>
    %cst_24 = arith.constant dense<0.000000e+00> : vector<16x128xf32>
    %22 = tpu.matmul %19, %21, %cst_24 {dimension_numbers = #tpu.dot_dimension_numbers<[1], [0], [0], [1], [0, 0, 1, 1], [], []>} : vector<16x128xf32>, vector<128x128xf32>, vector<16x128xf32> -> vector<16x128xf32>
    %23 = arith.addf %18, %22 : vector<16x128xf32>
    %cst_25 = arith.constant 0.000000e+00 : f32
    %24 = vector.broadcast %cst_25 : f32 to vector<16x128xf32>
    %25 = arith.maximumf %23, %24 : vector<16x128xf32>
    %c0_26 = arith.constant 0 : index
    %c0_27 = arith.constant 0 : index
    %26 = vector.load %arg8[%c0_26, %c0_27] : memref<18x128xf32, #tpu.memory_space<vmem>>, vector<1x128xf32>
    tpu.vector_store %arg8[%c0_26, %c0_27], %2 {strides = array<i32>} : memref<18x128xf32, #tpu.memory_space<vmem>>, vector<1x128xf32>,
    %c17_28 = arith.constant 17 : index
    %c0_29 = arith.constant 0 : index
    %27 = vector.load %arg8[%c17_28, %c0_29] : memref<18x128xf32, #tpu.memory_space<vmem>>, vector<1x128xf32>
    tpu.vector_store %arg8[%c17_28, %c0_29], %2 {strides = array<i32>} : memref<18x128xf32, #tpu.memory_space<vmem>>, vector<1x128xf32>,
    %c1_30 = arith.constant 1 : index
    %c0_31 = arith.constant 0 : index
    %28 = vector.load %arg8[%c1_30, %c0_31] : memref<18x128xf32, #tpu.memory_space<vmem>>, vector<16x128xf32>
    tpu.vector_store %arg8[%c1_30, %c0_31], %25 {strides = array<i32>} : memref<18x128xf32, #tpu.memory_space<vmem>>, vector<16x128xf32>,
    %c0_32 = arith.constant 0 : index
    %c0_33 = arith.constant 0 : index
    %29 = vector.load %arg5[%c0_32, %c0_33] : memref<1x128xf32, #tpu.memory_space<vmem>>, vector<1x128xf32>
    %30 = vector.shape_cast %29 : vector<1x128xf32> to vector<1x128xf32>
    %31 = vector.broadcast %30 : vector<1x128xf32> to vector<16x128xf32>
    %c0_34 = arith.constant 0 : index
    %c0_35 = arith.constant 0 : index
    %32 = vector.load %arg8[%c0_34, %c0_35] : memref<18x128xf32, #tpu.memory_space<vmem>>, vector<16x128xf32>
    %c0_36 = arith.constant 0 : index
    %c0_37 = arith.constant 0 : index
    %c0_38 = arith.constant 0 : index
    %33 = vector.load %arg4[%c0_36, %c0_37, %c0_38] : memref<3x128x128xf32, #tpu.memory_space<vmem>>, vector<1x128x128xf32>
    %34 = vector.shape_cast %33 : vector<1x128x128xf32> to vector<128x128xf32>
    %cst_39 = arith.constant dense<0.000000e+00> : vector<16x128xf32>
    %35 = tpu.matmul %32, %34, %cst_39 {dimension_numbers = #tpu.dot_dimension_numbers<[1], [0], [0], [1], [0, 0, 1, 1], [], []>} : vector<16x128xf32>, vector<128x128xf32>, vector<16x128xf32> -> vector<16x128xf32>
    %36 = arith.addf %31, %35 : vector<16x128xf32>
    %c1_40 = arith.constant 1 : index
    %c0_41 = arith.constant 0 : index
    %37 = vector.load %arg8[%c1_40, %c0_41] : memref<18x128xf32, #tpu.memory_space<vmem>>, vector<16x128xf32>
    %c1_42 = arith.constant 1 : index
    %c0_43 = arith.constant 0 : index
    %c0_44 = arith.constant 0 : index
    %38 = vector.load %arg4[%c1_42, %c0_43, %c0_44] : memref<3x128x128xf32, #tpu.memory_space<vmem>>, vector<1x128x128xf32>
    %39 = vector.shape_cast %38 : vector<1x128x128xf32> to vector<128x128xf32>
    %cst_45 = arith.constant dense<0.000000e+00> : vector<16x128xf32>
    %40 = tpu.matmul %37, %39, %cst_45 {dimension_numbers = #tpu.dot_dimension_numbers<[1], [0], [0], [1], [0, 0, 1, 1], [], []>} : vector<16x128xf32>, vector<128x128xf32>, vector<16x128xf32> -> vector<16x128xf32>
    %41 = arith.addf %36, %40 : vector<16x128xf32>
    %c2_46 = arith.constant 2 : index
    %c0_47 = arith.constant 0 : index
    %42 = vector.load %arg8[%c2_46, %c0_47] : memref<18x128xf32, #tpu.memory_space<vmem>>, vector<16x128xf32>
    %c2_48 = arith.constant 2 : index
    %c0_49 = arith.constant 0 : index
    %c0_50 = arith.constant 0 : index
    %43 = vector.load %arg4[%c2_48, %c0_49, %c0_50] : memref<3x128x128xf32, #tpu.memory_space<vmem>>, vector<1x128x128xf32>
    %44 = vector.shape_cast %43 : vector<1x128x128xf32> to vector<128x128xf32>
    %cst_51 = arith.constant dense<0.000000e+00> : vector<16x128xf32>
    %45 = tpu.matmul %42, %44, %cst_51 {dimension_numbers = #tpu.dot_dimension_numbers<[1], [0], [0], [1], [0, 0, 1, 1], [], []>} : vector<16x128xf32>, vector<128x128xf32>, vector<16x128xf32> -> vector<16x128xf32>
    %46 = arith.addf %41, %45 : vector<16x128xf32>
    %47 = arith.addf %46, %1 : vector<16x128xf32>
    %cst_52 = arith.constant 0.000000e+00 : f32
    %48 = vector.broadcast %cst_52 : f32 to vector<16x128xf32>
    %49 = arith.maximumf %47, %48 : vector<16x128xf32>
    %c0_53 = arith.constant 0 : index
    %c0_54 = arith.constant 0 : index
    %c0_55 = arith.constant 0 : index
    %50 = vector.load %arg6[%c0_53, %c0_54, %c0_55] : memref<1x16x128xf32, #tpu.memory_space<vmem>>, vector<1x16x128xf32>
    %51 = vector.shape_cast %50 : vector<1x16x128xf32> to vector<16x128xf32>
    %52 = vector.shape_cast %49 : vector<16x128xf32> to vector<1x16x128xf32>
    tpu.vector_store %arg6[%c0_53, %c0_54, %c0_55], %52 {strides = array<i32>} : memref<1x16x128xf32, #tpu.memory_space<vmem>>, vector<1x16x128xf32>,
    return
  }
  func.func @transform_0(%arg0: i32) -> (i32, i32, i32) {
    %c0_i32 = arith.constant 0 : i32
    %c0_i32_0 = arith.constant 0 : i32
    %c0_i32_1 = arith.constant 0 : i32
    return %arg0, %c0_i32, %c0_i32_0 : i32, i32, i32
  }
  func.func @transform_1(%arg0: i32) -> (i32, i32, i32) {
    %c0_i32 = arith.constant 0 : i32
    %c0_i32_0 = arith.constant 0 : i32
    %c0_i32_1 = arith.constant 0 : i32
    %c0_i32_2 = arith.constant 0 : i32
    return %c0_i32, %c0_i32_0, %c0_i32_1 : i32, i32, i32
  }
  func.func @transform_2(%arg0: i32) -> (i32, i32) {
    %c0_i32 = arith.constant 0 : i32
    %c0_i32_0 = arith.constant 0 : i32
    %c0_i32_1 = arith.constant 0 : i32
    return %c0_i32, %c0_i32_0 : i32, i32
  }
  func.func @transform_3(%arg0: i32) -> (i32, i32, i32) {
    %c0_i32 = arith.constant 0 : i32
    %c0_i32_0 = arith.constant 0 : i32
    %c0_i32_1 = arith.constant 0 : i32
    %c0_i32_2 = arith.constant 0 : i32
    return %c0_i32, %c0_i32_0, %c0_i32_1 : i32, i32, i32
  }
  func.func @transform_4(%arg0: i32) -> (i32, i32) {
    %c0_i32 = arith.constant 0 : i32
    %c0_i32_0 = arith.constant 0 : i32
    %c0_i32_1 = arith.constant 0 : i32
    return %c0_i32, %c0_i32_0 : i32, i32
  }
  func.func @transform_5(%arg0: i32) -> (i32, i32, i32) {
    %c0_i32 = arith.constant 0 : i32
    %c0_i32_0 = arith.constant 0 : i32
    %c0_i32_1 = arith.constant 0 : i32
    return %arg0, %c0_i32, %c0_i32_0 : i32, i32, i32
  }
}

</mosaic_0001>

<bundles_post_ra>
// kernel: tile.13
= control target key start
LH: loop header
LB: loop body
LE: loop exit
PB: predicated region body
PF: predicated region fallthrough
CT: control target
= control target key end

     0   :  { %s28_s0 = inlined_call_operand.vmem [shape: f32[8], index: 0, kind: input, shape index: {}]   ;;  %s29_s1 = inlined_call_operand.vmem [shape: f32[16,8], index: 1, kind: output, shape index: {}]  }
   0x1   :  { %v4_v0 = vld [vmem:[%s28_s0] ss:$0 sm:$0xff] }
   0x2   :  { %5 = vst [vmem:[%s29_s1] sm:$0xff] %v4_v0 }
   0x3   :  { %8 = vst [vmem:[%s29_s1 + $0x8] sm:$0xff] %v4_v0 }

// kernel: tile.14
= control target key start
LH: loop header
LB: loop body
LE: loop exit
PB: predicated region body
PF: predicated region fallthrough
CT: control target
= control target key end

     0   :  { %s131_s10 = smov 120   ;;  %s132_s11 = smov 104   ;;  %vm3_vm0 = vcmask 64512   ;;  %vm9_vm1 = vcmask 1048512   ;;  %vm15_vm2 = vcmask 982912   ;;  %vm21_vm3 = vcmask 917312   ;;  %s207_s0 = inlined_call_operand.vmem [shape: f32[16,8], index: 0, kind: input, shape index: {}]   ;;  %s208_s1 = inlined_call_operand.vmem [shape: f32[1,128], index: 1, kind: output, shape index: {}]  }
   0x1   :  { %v101_v0 = vld [vmem:[%s207_s0 + $0xf] sm:$0x1]   ;;  %v103_v1 = vld [vmem:[%s207_s0 + $0xd] sm:$0x1]   ;;  %v105_v2 = vld [vmem:[%s207_s0 + $0xb] sm:$0x1]  }
   0x2   :  { %7 = vrot.lane.b32.xlu0 %v101_v0, %s131_s10  ;;  %19 = vrot.lane.b32.xlu1 %v103_v1, %s132_s11  ;;  %s133_s14 = smov 88   ;;  %v102_v3 = vld [vmem:[%s207_s0 + $0xe] sm:$0x1]   ;;  %v104_v4 = vld [vmem:[%s207_s0 + $0xc] sm:$0x1]   ;;  %s134_s19 = smov 112  }
   0x3   :  { %31 = vrot.lane.b32.xlu2 %v105_v2, %s133_s14  ;;  %s135_s20 = smov 96   ;;  %v106_v5 = vld [vmem:[%s207_s0 + $0xa] sm:$0x1]   ;;  %s136_s23 = smov 80   ;;  %v107_v6 = vld [vmem:[%s207_s0 + $0x9] sm:$0x1]  }
   0x4   :  { %v108_v7 = vld [vmem:[%s207_s0 + $0x8] sm:$0x1]   ;;  %s137_s28 = smov 72   ;;  %s138_s29 = smov 64   ;;  %v109_v8 = vld [vmem:[%s207_s0 + $0x7] sm:$0x1]  }
   0x5   :  { %s139_s3 = smov 56   ;;  %v110_v9 = vld [vmem:[%s207_s0 + $0x6] sm:$0x1]   ;;  %v111_v10 = vld [vmem:[%s207_s0 + $0x5] sm:$0x1]   ;;  %s140_s8 = smov 48  }
   0x6   :  { %s141_s9 = smov 40   ;;  %v112_v11 = vld [vmem:[%s207_s0 + $0x4] sm:$0x1]   ;;  %s142_s12 = smov 32   ;;  %v113_v12 = vld [vmem:[%s207_s0 + $0x3] sm:$0x1]  }
   0x7   :  { %v114_v13 = vld [vmem:[%s207_s0 + $0x2] sm:$0x1]   ;;  %s143_s17 = smov 24   ;;  %s144_s18 = smov 16   ;;  %v115_v14 = vld [vmem:[%s207_s0 + $0x1] sm:$0x1]  }
   0x8   :  { %s145_s21 = smov 8   ;;  %v2_v15 = vld [vmem:[%s207_s0] sm:$0x1]   ;;  %vm27_vm4 = vcmask 851712   ;;  %vm33_vm5 = vcmask 786112   ;;  %vm39_vm6 = vcmask 720512  }
   0x9   :  { %4 = vst.msk [vmem:[#allocation0] sm:$0x1] %vm3_vm0, %v2_v15   ;;  %vm45_vm7 = vcmask 654912   ;;  %vm51_vm8 = vcmask 589312   ;;  %vm57_vm9 = vcmask 523712   ;;  %vm63_vm10 = vcmask 458112  }
   0xa   :  { %13 = vrot.lane.b32.xlu0 %v102_v3, %s134_s19  ;;  %25 = vrot.lane.b32.xlu1 %v104_v4, %s135_s20  ;;  %vm69_vm11 = vcmask 392512   ;;  %vm75_vm12 = vcmask 326912   ;;  %vm81_vm13 = vcmask 261312   ;;  %vm87_vm14 = vcmask 195712  }
   0xb   :  { %37 = vrot.lane.b32.xlu2 %v106_v5, %s136_s23  ;;  %vm93_vm15 = vcmask 130112  }
  0x12   :  { %43 = vrot.lane.b32.xlu0 %v107_v6, %s137_s28  ;;  %49 = vrot.lane.b32.xlu1 %v108_v7, %s138_s29 }
  0x13   :  { %55 = vrot.lane.b32.xlu2 %v109_v8, %s139_s3 }
  0x1a   :  { %61 = vrot.lane.b32.xlu0 %v110_v9, %s140_s8  ;;  %67 = vrot.lane.b32.xlu1 %v111_v10, %s141_s9 }
  0x1b   :  { %73 = vrot.lane.b32.xlu2 %v112_v11, %s142_s12 }
  0x22   :  { %79 = vrot.lane.b32.xlu0 %v113_v12, %s143_s17  ;;  %85 = vrot.lane.b32.xlu1 %v114_v13, %s144_s18 }
  0x23   :  { %91 = vrot.lane.b32.xlu2 %v115_v14, %s145_s21 }
  0x5d   :  { %v32_v16 = vpop.permute.xlu2 %31  }
  0x65   :  { %v38_v17 = vpop.permute.xlu2 %37  }
  0x6d   :  { %v56_v18 = vpop.permute.xlu2 %55  }
  0x74   :  { %v8_v19 = vpop.permute.xlu0 %7   ;;  %v20_v20 = vpop.permute.xlu1 %19  }
  0x75   :  { %10 = vst.msk [vmem:[#allocation0] sm:$0x1] %vm9_vm1, %v8_v19   ;;  %v74_v21 = vpop.permute.xlu2 %73  }
  0x7c   :  { %v14_v22 = vpop.permute.xlu0 %13   ;;  %v26_v23 = vpop.permute.xlu1 %25  }
  0x7d   :  { %16 = vst.msk [vmem:[#allocation0] sm:$0x1] %vm15_vm2, %v14_v22   ;;  %v92_v24 = vpop.permute.xlu2 %91  }
  0x7e   :  { %22 = vst.msk [vmem:[#allocation0] sm:$0x1] %vm21_vm3, %v20_v20  }
  0x7f   :  { %28 = vst.msk [vmem:[#allocation0] sm:$0x1] %vm27_vm4, %v26_v23  }
  0x80   :  { %34 = vst.msk [vmem:[#allocation0] sm:$0x1] %vm33_vm5, %v32_v16  }
  0x81   :  { %40 = vst.msk [vmem:[#allocation0] sm:$0x1] %vm39_vm6, %v38_v17  }
  0x84   :  { %v44_v25 = vpop.permute.xlu0 %43   ;;  %v50_v26 = vpop.permute.xlu1 %49  }
  0x85   :  { %46 = vst.msk [vmem:[#allocation0] sm:$0x1] %vm45_vm7, %v44_v25  }
  0x86   :  { %52 = vst.msk [vmem:[#allocation0] sm:$0x1] %vm51_vm8, %v50_v26  }
  0x87   :  { %58 = vst.msk [vmem:[#allocation0] sm:$0x1] %vm57_vm9, %v56_v18  }
  0x8c   :  { %v62_v27 = vpop.permute.xlu0 %61   ;;  %v68_v28 = vpop.permute.xlu1 %67  }
  0x8d   :  { %64 = vst.msk [vmem:[#allocation0] sm:$0x1] %vm63_vm10, %v62_v27  }
  0x8e   :  { %70 = vst.msk [vmem:[#allocation0] sm:$0x1] %vm69_vm11, %v68_v28  }
  0x8f   :  { %76 = vst.msk [vmem:[#allocation0] sm:$0x1] %vm75_vm12, %v74_v21  }
  0x94   :  { %v80_v29 = vpop.permute.xlu0 %79   ;;  %v86_v30 = vpop.permute.xlu1 %85  }
  0x95   :  { %82 = vst.msk [vmem:[#allocation0] sm:$0x1] %vm81_vm13, %v80_v29  }
  0x96   :  { %88 = vst.msk [vmem:[#allocation0] sm:$0x1] %vm87_vm14, %v86_v30  }
  0x97   :  { %94 = vst.msk [vmem:[#allocation0] sm:$0x1] %vm93_vm15, %v92_v24  }
  0x9e   :  { %v97_v31 = vld [vmem:[#allocation0] sm:$0x1] }
  0x9f   :  { %100 = vst [vmem:[%s208_s1] sm:$0x1] %v97_v31 }

// kernel: resnet_block.1
= control target key start
LH: loop header
LB: loop body
LE: loop exit
PB: predicated region body
PF: predicated region fallthrough
CT: control target
= control target key end

     0   :  { %s727_s18 = smov 0   ;;  %s1065_s0 = inlined_call_operand.vmem [shape: f32[2,16,128], index: 0, kind: input, shape index: {}]   ;;  %s1066_s1 = inlined_call_operand.vmem [shape: f32[3,128,128], index: 1, kind: input, shape index: {}]   ;;  %s1067_s2 = inlined_call_operand.vmem [shape: f32[1,128], index: 2, kind: input, shape index: {}]   ;;  %s1068_s3 = inlined_call_operand.vmem [shape: f32[3,128,128], index: 3, kind: input, shape index: {}]   ;;  %s1069_s4 = inlined_call_operand.vmem [shape: f32[1,128], index: 4, kind: input, shape index: {}]   ;;  %s1070_s5 = inlined_call_operand.vmem [shape: f32[2,16,128], index: 5, kind: output, shape index: {}]  }
   0x1 LB: > { %s568_s19 = sadd.s32 4294967295, %s694_s18   ;;  %p572_p0 = scmp.ge.s32.totalorder %s694_s18, 1  ;;  %s694_s18 = sphi %s727_s18, %s15_s18  }
   0x2   : > { %p187_p1 = scmp.lt.s32.totalorder %s694_s18, 3 }
   0x4   : > { %p188_p2 = pnand %p572_p0, %p187_p1 }
   0x5   : > { %p752_p3 = scmp.lt.s32.totalorder (!%p188_p2), %s568_s19, 1 }
   0x6   : > { %191 = sbr.rel (%p188_p2) target bundleno = 342 (0x156), region = 40 }
   0xb   : > { %v608_v0 = vld [vmem:[%s1066_s1 + $0x178] sm:$0xff]  ;;  %v607_v2 = vld [vmem:[%s1066_s1 + $0x170] sm:$0xff]  ;;  %v696_v5 = vmov 0.0   ;;  %v606_v6 = vld [vmem:[%s1066_s1 + $0x168] sm:$0xff]  ;;  %s1073_s19 = smov (!%p752_p3, %s568_s19), 1 }
   0xc   : > { %v252_v1 = vld [vmem:[%s1066_s1 + $0x78] sm:$0xff]  ;;  %341 = vmatpush.msra.mxu2 %v608_v0  ;;  %v251_v3 = vld [vmem:[%s1066_s1 + $0x70] sm:$0xff]  ;;  %227 = vst [vmem:[#allocation2] sm:$0x1] %v696_v5  ;;  %v250_v7 = vld [vmem:[%s1066_s1 + $0x68] sm:$0xff]  ;;  %s643_s9 = sshll.u32 %s1073_s19, 4 }
   0xd   : > { %253 = vmatpush.msra.mxu0 %v252_v1  ;;  %v592_v4 = vld [vmem:[%s1066_s1 + $0xf8] sm:$0xff]  ;;  %v591_v8 = vld [vmem:[%s1066_s1 + $0xf0] sm:$0xff]  ;;  %228 = vst [vmem:[#allocation2 + $0x11] sm:$0x1] %v696_v5  ;;  %v590_v9 = vld [vmem:[%s1066_s1 + $0xe8] sm:$0xff]  ;;  %s219_s24 = scalar_lea.vmem %s1065_s0, %s643_s9  ;;  %s224_s23 = scalar_lea.vmem %s1070_s5, %s643_s9 }
   0xe   : > { %297 = vmatpush.msra.mxu1 %v592_v4  ;;  %342 = vmatpush.msra.mxu2 %v607_v2  ;;  %368 = vst [vmem:[#allocation3] sm:$0x1] %v696_v5  ;;  %v605_v10 = vld [vmem:[%s1066_s1 + $0x160] sm:$0xff]  ;;  %v604_v13 = vld [vmem:[%s1066_s1 + $0x158] sm:$0xff]  ;;  %v603_v16 = vld [vmem:[%s1066_s1 + $0x150] sm:$0xff] }
   0xf   : > { %254 = vmatpush.msra.mxu0 %v251_v3  ;;  %v249_v11 = vld [vmem:[%s1066_s1 + $0x60] sm:$0xff]  ;;  %369 = vst [vmem:[#allocation3 + $0x11] sm:$0x1] %v696_v5  ;;  %v248_v14 = vld [vmem:[%s1066_s1 + $0x58] sm:$0xff]  ;;  %v247_v17 = vld [vmem:[%s1066_s1 + $0x50] sm:$0xff] }
  0x10   : > { %298 = vmatpush.msra.mxu1 %v591_v8  ;;  %343 = vmatpush.msra.mxu2 %v606_v6  ;;  %v589_v12 = vld [vmem:[%s1066_s1 + $0xe0] sm:$0xff]  ;;  %v588_v15 = vld [vmem:[%s1066_s1 + $0xd8] sm:$0xff]  ;;  %v587_v18 = vld [vmem:[%s1066_s1 + $0xd0] sm:$0xff] }
  0x11   : > { %255 = vmatpush.msra.mxu0 %v250_v7  ;;  %v602_v19 = vld [vmem:[%s1066_s1 + $0x148] sm:$0xff]  ;;  %v601_v22 = vld [vmem:[%s1066_s1 + $0x140] sm:$0xff]  ;;  %v600_v25 = vld [vmem:[%s1066_s1 + $0x138] sm:$0xff] }
  0x12   : > { %299 = vmatpush.msra.mxu1 %v590_v9  ;;  %344 = vmatpush.msra.mxu2 %v605_v10  ;;  %v246_v20 = vld [vmem:[%s1066_s1 + $0x48] sm:$0xff]  ;;  %v245_v23 = vld [vmem:[%s1066_s1 + $0x40] sm:$0xff]  ;;  %v244_v26 = vld [vmem:[%s1066_s1 + $0x38] sm:$0xff] }
  0x13   : > { %256 = vmatpush.msra.mxu0 %v249_v11  ;;  %v586_v21 = vld [vmem:[%s1066_s1 + $0xc8] sm:$0xff]  ;;  %v585_v24 = vld [vmem:[%s1066_s1 + $0xc0] sm:$0xff]  ;;  %v584_v27 = vld [vmem:[%s1066_s1 + $0xb8] sm:$0xff] }
  0x14   : > { %300 = vmatpush.msra.mxu1 %v589_v12  ;;  %345 = vmatpush.msra.mxu2 %v604_v13  ;;  %v834_v28 = vld [vmem:[%s219_s24] sm:$0xff]  ;;  %v836_v29 = vld [vmem:[%s219_s24 + $0x8] sm:$0xff]  ;;  %v599_v30 = vld [vmem:[%s1066_s1 + $0x130] sm:$0xff] }
  0x15   : > { %257 = vmatpush.msra.mxu0 %v248_v14  ;;  %v243_v31 = vld [vmem:[%s1066_s1 + $0x30] sm:$0xff]  ;;  %229 = vst [vmem:[#allocation2 + $0x1] sm:$0xff] %v834_v28  ;;  %v393_v32 = vld [vmem:[%s1068_s3 + $0x78] sm:$0xff]  ;;  %v598_v35 = vld [vmem:[%s1066_s1 + $0x128] sm:$0xff] }
  0x16   : > { %301 = vmatpush.msra.mxu1 %v588_v15  ;;  %346 = vmatpush.msra.mxu2 %v603_v16  ;;  %v583_v33 = vld [vmem:[%s1066_s1 + $0xb0] sm:$0xff]  ;;  %230 = vst [vmem:[#allocation2 + $0x9] sm:$0xff] %v836_v29  ;;  %v242_v36 = vld [vmem:[%s1066_s1 + $0x28] sm:$0xff]  ;;  %v597_v39 = vld [vmem:[%s1066_s1 + $0x120] sm:$0xff] }
  0x17   : > { %258 = vmatpush.msra.mxu0 %v247_v17  ;;  %v392_v34 = vld [vmem:[%s1068_s3 + $0x70] sm:$0xff]  ;;  %394 = vmatpush.msra.mxu3 %v393_v32  ;;  %v582_v37 = vld [vmem:[%s1066_s1 + $0xa8] sm:$0xff]  ;;  %v241_v40 = vld [vmem:[%s1066_s1 + $0x20] sm:$0xff] }
  0x18   : > { %302 = vmatpush.msra.mxu1 %v587_v18  ;;  %347 = vmatpush.msra.mxu2 %v602_v19  ;;  %v391_v38 = vld [vmem:[%s1068_s3 + $0x68] sm:$0xff]  ;;  %v581_v41 = vld [vmem:[%s1066_s1 + $0xa0] sm:$0xff]  ;;  %v596_v43 = vld [vmem:[%s1066_s1 + $0x118] sm:$0xff] }
  0x19   : > { %259 = vmatpush.msra.mxu0 %v246_v20  ;;  %395 = vmatpush.msra.mxu3 %v392_v34  ;;  %v390_v42 = vld [vmem:[%s1068_s3 + $0x60] sm:$0xff]  ;;  %v240_v44 = vld [vmem:[%s1066_s1 + $0x18] sm:$0xff]  ;;  %v595_v47 = vld [vmem:[%s1066_s1 + $0x110] sm:$0xff] }
  0x1a   : > { %303 = vmatpush.msra.mxu1 %v586_v21  ;;  %348 = vmatpush.msra.mxu2 %v601_v22  ;;  %v580_v45 = vld [vmem:[%s1066_s1 + $0x98] sm:$0xff]  ;;  %v239_v48 = vld [vmem:[%s1066_s1 + $0x10] sm:$0xff]  ;;  %v594_v51 = vld [vmem:[%s1066_s1 + $0x108] sm:$0xff] }
  0x1b   : > { %260 = vmatpush.msra.mxu0 %v245_v23  ;;  %396 = vmatpush.msra.mxu3 %v391_v38  ;;  %v389_v46 = vld [vmem:[%s1068_s3 + $0x58] sm:$0xff]  ;;  %v579_v49 = vld [vmem:[%s1066_s1 + $0x90] sm:$0xff]  ;;  %v238_v52 = vld [vmem:[%s1066_s1 + $0x8] sm:$0xff] }
  0x1c   : > { %304 = vmatpush.msra.mxu1 %v585_v24  ;;  %349 = vmatpush.msra.mxu2 %v600_v25  ;;  %v388_v50 = vld [vmem:[%s1068_s3 + $0x50] sm:$0xff]  ;;  %v578_v53 = vld [vmem:[%s1066_s1 + $0x88] sm:$0xff]  ;;  %v593_v55 = vld [vmem:[%s1066_s1 + $0x100] sm:$0xff] }
  0x1d   : > { %261 = vmatpush.msra.mxu0 %v244_v26  ;;  %397 = vmatpush.msra.mxu3 %v390_v42  ;;  %v387_v54 = vld [vmem:[%s1068_s3 + $0x48] sm:$0xff]  ;;  %v237_v56 = vld [vmem:[%s1066_s1] sm:$0xff]  ;;  %v624_v61 = vld [vmem:[%s1068_s3 + $0xf8] sm:$0xff] }
  0x1e   : > { %305 = vmatpush.msra.mxu1 %v584_v27  ;;  %350 = vmatpush.msra.mxu2 %v599_v30  ;;  %v322_v57 = vld [vmem:[#allocation2 + $0x2] sm:$0xff]  ;;  %v385_v62 = vld [vmem:[%s1068_s3 + $0x38] sm:$0xff]  ;;  %v623_v63 = vld [vmem:[%s1068_s3 + $0xf0] sm:$0xff] }
  0x1f   : > { %262 = vmatpush.msra.mxu0 %v243_v31  ;;  %398 = vmatpush.msra.mxu3 %v389_v46  ;;  %v235_v58 = vld [vmem:[#allocation2] sm:$0xff]  ;;  %v640_v0 = vld [vmem:[%s1068_s3 + $0x178] sm:$0xff]  ;;  %v384_v1 = vld [vmem:[%s1068_s3 + $0x30] sm:$0xff] }
  0x20   : > { %306 = vmatpush.msra.mxu1 %v583_v33  ;;  %351 = vmatpush.msra.mxu2 %v598_v35  ;;  %v577_v59 = vld [vmem:[%s1066_s1 + $0x80] sm:$0xff]  ;;  %v622_v2 = vld [vmem:[%s1068_s3 + $0xe8] sm:$0xff]  ;;  %v639_v3 = vld [vmem:[%s1068_s3 + $0x170] sm:$0xff] }
  0x21   : > { %263 = vmatpush.msra.mxu0 %v242_v36  ;;  %399 = vmatpush.msra.mxu3 %v388_v50  ;;  %v386_v60 = vld [vmem:[%s1068_s3 + $0x40] sm:$0xff]  ;;  %v383_v4 = vld [vmem:[%s1068_s3 + $0x28] sm:$0xff]  ;;  %v620_v9 = vld [vmem:[%s1068_s3 + $0xd8] sm:$0xff] }
  0x22   : > { %307 = vmatpush.msra.mxu1 %v582_v37  ;;  %352 = vmatpush.msra.mxu2 %v597_v39  ;;  %v323_v5 = vld [vmem:[#allocation2 + $0xa] sm:$0xff]  ;;  %v621_v7 = vld [vmem:[%s1068_s3 + $0xe0] sm:$0xff]  ;;  %v381_v10 = vld [vmem:[%s1068_s3 + $0x18] sm:$0xff] }
  0x23   : > { %264 = vmatpush.msra.mxu0 %v241_v40  ;;  %400 = vmatpush.msra.mxu3 %v387_v54  ;;  %v236_v6 = vld [vmem:[#allocation2 + $0x8] sm:$0xff]  ;;  %v382_v8 = vld [vmem:[%s1068_s3 + $0x20] sm:$0xff]  ;;  %v619_v12 = vld [vmem:[%s1068_s3 + $0xd0] sm:$0xff] }
  0x24   : > { %308 = vmatpush.msra.mxu1 %v581_v41  ;;  %353 = vmatpush.msra.mxu2 %v596_v43  ;;  %v638_v11 = vld [vmem:[%s1068_s3 + $0x168] sm:$0xff]  ;;  %v380_v13 = vld [vmem:[%s1068_s3 + $0x10] sm:$0xff]  ;;  %v617_v16 = vld [vmem:[%s1068_s3 + $0xc0] sm:$0xff] }
  0x25   : > { %265 = vmatpush.msra.mxu0 %v240_v44  ;;  %401 = vmatpush.msra.mxu3 %v386_v60  ;;  %v618_v14 = vld [vmem:[%s1068_s3 + $0xc8] sm:$0xff]  ;;  %v616_v17 = vld [vmem:[%s1068_s3 + $0xb8] sm:$0xff]  ;;  %v615_v18 = vld [vmem:[%s1068_s3 + $0xb0] sm:$0xff] }
  0x26   : > { %309 = vmatpush.msra.mxu1 %v580_v45  ;;  %354 = vmatpush.msra.mxu2 %v595_v47  ;;  %v379_v15 = vld [vmem:[%s1068_s3 + $0x8] sm:$0xff]  ;;  %v637_v20 = vld [vmem:[%s1068_s3 + $0x160] sm:$0xff]  ;;  %v636_v23 = vld [vmem:[%s1068_s3 + $0x158] sm:$0xff] }
  0x27   : > { %266 = vmatpush.msra.mxu0 %v239_v48  ;;  %402 = vmatpush.msra.mxu3 %v385_v62  ;;  %v614_v19 = vld [vmem:[%s1068_s3 + $0xa8] sm:$0xff]  ;;  %v378_v21 = vld [vmem:[%s1068_s3] sm:$0xff]  ;;  %v612_v24 = vld [vmem:[%s1068_s3 + $0x98] sm:$0xff] }
  0x28   : > { %310 = vmatpush.msra.mxu1 %v579_v49  ;;  %355 = vmatpush.msra.mxu2 %v594_v51  ;;  %v613_v22 = vld [vmem:[%s1068_s3 + $0xa0] sm:$0xff]  ;;  %v635_v25 = vld [vmem:[%s1068_s3 + $0x150] sm:$0xff]  ;;  %v634_v27 = vld [vmem:[%s1068_s3 + $0x148] sm:$0xff] }
  0x29   : > { %267 = vmatpush.msra.mxu0 %v238_v52  ;;  %403 = vmatpush.msra.mxu3 %v384_v1  ;;  %v611_v26 = vld [vmem:[%s1068_s3 + $0x90] sm:$0xff]  ;;  %v610_v30 = vld [vmem:[%s1068_s3 + $0x88] sm:$0xff]  ;;  %v633_v31 = vld [vmem:[%s1068_s3 + $0x140] sm:$0xff] }
  0x2a   : > { %311 = vmatpush.msra.mxu1 %v578_v53  ;;  %356 = vmatpush.msra.mxu2 %v593_v55  ;;  %v609_v32 = vld [vmem:[%s1068_s3 + $0x80] sm:$0xff]  ;;  %v632_v33 = vld [vmem:[%s1068_s3 + $0x138] sm:$0xff]  ;;  %v631_v34 = vld [vmem:[%s1068_s3 + $0x130] sm:$0xff] }
  0x2b   : > { %268 = vmatpush.msra.mxu0 %v237_v56  ;;  %357 = vmatmul.f32.vlgmr.msra.gmra.mxu2 %v322_v57  ;;  %v630_v35 = vld [vmem:[%s1068_s3 + $0x128] sm:$0xff]  ;;  %v629_v36 = vld [vmem:[%s1068_s3 + $0x120] sm:$0xff]  ;;  %v628_v37 = vld [vmem:[%s1068_s3 + $0x118] sm:$0xff] }
  0x2c   : > { %269 = vmatmul.f32.vlgmr.msra.gmra.mxu0 %v235_v58  ;;  %312 = vmatpush.msra.mxu1 %v577_v59  ;;  %v627_v38 = vld [vmem:[%s1068_s3 + $0x110] sm:$0xff]  ;;  %v626_v39 = vld [vmem:[%s1068_s3 + $0x108] sm:$0xff]  ;;  %v625_v40 = vld [vmem:[%s1068_s3 + $0x100] sm:$0xff] }
  0x2d   : > { %313 = vmatmul.f32.vlgmr.msra.gmra.mxu1 %v834_v28  ;;  %438 = vmatpush.msrb.mxu0 %v624_v61  ;;  %v686_v41 = vld [vmem:[%s1067_s2] ss:$0 sm:$0xff] }
  0x2e   : > { %645 = vmatpush.msrb.mxu2 %v624_v61  ;;  %482 = vmatpush.msrb.mxu1 %v640_v0  ;;  %v687_v60 = vld [vmem:[%s1069_s4] ss:$0 sm:$0xff] }
  0x2f   : > { %439 = vmatpush.msrb.mxu0 %v623_v63  ;;  %404 = vmatpush.msra.mxu3 %v383_v4 }
  0x30   : > { %646 = vmatpush.msrb.mxu2 %v623_v63  ;;  %483 = vmatpush.msrb.mxu1 %v639_v3 }
  0x31   : > { %440 = vmatpush.msrb.mxu0 %v622_v2  ;;  %405 = vmatpush.msra.mxu3 %v382_v8 }
  0x32   : > { %647 = vmatpush.msrb.mxu2 %v622_v2  ;;  %484 = vmatpush.msrb.mxu1 %v638_v11 }
  0x33   : > { %360 = vmatmul.f32.gmra.mxu2 %v323_v5  ;;  %441 = vmatpush.msrb.mxu0 %v621_v7 }
  0x34   : > { %272 = vmatmul.f32.gmra.mxu0 %v236_v6  ;;  %648 = vmatpush.msrb.mxu2 %v621_v7 }
  0x35   : > { %316 = vmatmul.f32.gmra.mxu1 %v836_v29  ;;  %442 = vmatpush.msrb.mxu0 %v620_v9 }
  0x36   : > { %406 = vmatpush.msra.mxu3 %v381_v10  ;;  %649 = vmatpush.msrb.mxu2 %v620_v9 }
  0x37   : > { %443 = vmatpush.msrb.mxu0 %v619_v12  ;;  %485 = vmatpush.msrb.mxu1 %v637_v20 }
  0x38   : > { %407 = vmatpush.msra.mxu3 %v380_v13  ;;  %650 = vmatpush.msrb.mxu2 %v619_v12 }
  0x39   : > { %444 = vmatpush.msrb.mxu0 %v618_v14  ;;  %486 = vmatpush.msrb.mxu1 %v636_v23 }
  0x3a   : > { %408 = vmatpush.msra.mxu3 %v379_v15  ;;  %651 = vmatpush.msrb.mxu2 %v618_v14 }
  0x3b   : > { %445 = vmatpush.msrb.mxu0 %v617_v16  ;;  %487 = vmatpush.msrb.mxu1 %v635_v25 }
  0x3c   : > { %652 = vmatpush.msrb.mxu2 %v617_v16  ;;  %409 = vmatpush.msra.mxu3 %v378_v21 }
  0x3d   : > { %446 = vmatpush.msrb.mxu0 %v616_v17  ;;  %488 = vmatpush.msrb.mxu1 %v634_v27 }
  0x3e   : > { %653 = vmatpush.msrb.mxu2 %v616_v17  ;;  %661 = vmatpush.msrb.mxu3 %v640_v0 }
  0x3f   : > { %447 = vmatpush.msrb.mxu0 %v615_v18  ;;  %489 = vmatpush.msrb.mxu1 %v633_v31 }
  0x40   : > { %654 = vmatpush.msrb.mxu2 %v615_v18  ;;  %662 = vmatpush.msrb.mxu3 %v639_v3 }
  0x41   : > { %448 = vmatpush.msrb.mxu0 %v614_v19  ;;  %490 = vmatpush.msrb.mxu1 %v632_v33 }
  0x42   : > { %655 = vmatpush.msrb.mxu2 %v614_v19  ;;  %663 = vmatpush.msrb.mxu3 %v638_v11 }
  0x43   : > { %449 = vmatpush.msrb.mxu0 %v613_v22  ;;  %491 = vmatpush.msrb.mxu1 %v631_v34 }
  0x44   : > { %656 = vmatpush.msrb.mxu2 %v613_v22  ;;  %664 = vmatpush.msrb.mxu3 %v637_v20 }
  0x45   : > { %450 = vmatpush.msrb.mxu0 %v612_v24  ;;  %492 = vmatpush.msrb.mxu1 %v630_v35 }
  0x46   : > { %657 = vmatpush.msrb.mxu2 %v612_v24  ;;  %665 = vmatpush.msrb.mxu3 %v636_v23 }
  0x47   : > { %451 = vmatpush.msrb.mxu0 %v611_v26  ;;  %493 = vmatpush.msrb.mxu1 %v629_v36 }
  0x48   : > { %658 = vmatpush.msrb.mxu2 %v611_v26  ;;  %666 = vmatpush.msrb.mxu3 %v635_v25 }
  0x49   : > { %452 = vmatpush.msrb.mxu0 %v610_v30  ;;  %494 = vmatpush.msrb.mxu1 %v628_v37 }
  0x4a   : > { %659 = vmatpush.msrb.mxu2 %v610_v30  ;;  %667 = vmatpush.msrb.mxu3 %v634_v27 }
  0x4b   : > { %453 = vmatpush.msrb.mxu0 %v609_v32  ;;  %495 = vmatpush.msrb.mxu1 %v627_v38 }
  0x4c   : > { %660 = vmatpush.msrb.mxu2 %v609_v32  ;;  %668 = vmatpush.msrb.mxu3 %v633_v31 }
  0x4d   : > { %496 = vmatpush.msrb.mxu1 %v626_v39 }
  0x4e   : > { %669 = vmatpush.msrb.mxu3 %v632_v33 }
  0x4f   : > { %497 = vmatpush.msrb.mxu1 %v625_v40 }
  0x50   : > { %670 = vmatpush.msrb.mxu3 %v631_v34 }
  0x52   : > { %671 = vmatpush.msrb.mxu3 %v630_v35 }
  0x54   : > { %672 = vmatpush.msrb.mxu3 %v629_v36 }
  0x56   : > { %673 = vmatpush.msrb.mxu3 %v628_v37 }
  0x58   : > { %674 = vmatpush.msrb.mxu3 %v627_v38 }
  0x5a   : > { %675 = vmatpush.msrb.mxu3 %v626_v39 }
  0x5c   : > { %676 = vmatpush.msrb.mxu3 %v625_v40 }
  0xa9   : > { %v270_v42 = vpop.f32.mrf.mxu0 }
  0xaa   : > { %v276_v43 = vadd.f32 %v686_v41, %v270_v42  ;;  %v314_v44 = vpop.f32.mrf.mxu1 }
  0xac   : > { %v320_v45 = vadd.f32 %v314_v44, %v276_v43 }
  0xae   : > { %v358_v46 = vpop.f32.mrf.mxu2 }
  0xaf   : > { %v364_v47 = vadd.f32 %v358_v46, %v320_v45 }
  0xb1   : > { %v273_v48 = vpop.f32.mrf.mxu0  ;;  %v366_v49 = vmax.f32 %v364_v47, 0.0 }
  0xb2   : > { %v277_v50 = vadd.f32 %v686_v41, %v273_v48  ;;  %v317_v51 = vpop.f32.mrf.mxu1 }
  0xb3   : > { %370 = vst [vmem:[#allocation3 + $0x1] sm:$0xff] %v366_v49  ;;  %454 = vmatmul.f32.vlgmr.msrb.gmra.mxu0 %v366_v49 }
  0xb4   : > { %v321_v52 = vadd.f32 %v317_v51, %v277_v50 }
  0xb6   : > { %v361_v53 = vpop.f32.mrf.mxu2 }
  0xb7   : > { %v365_v54 = vadd.f32 %v361_v53, %v321_v52 }
  0xb9   : > { %v367_v55 = vmax.f32 %v365_v54, 0.0 }
  0xba   : > { %v376_v56 = vld [vmem:[#allocation3] sm:$0xff] }
  0xbb   : > { %371 = vst [vmem:[#allocation3 + $0x9] sm:$0xff] %v367_v55  ;;  %410 = vmatmul.f32.vlgmr.msra.gmra.mxu3 %v376_v56  ;;  %457 = vmatmul.f32.vlgmr.msrb.gmra.mxu2 %v367_v55 }
  0xc2   : > { %v377_v57 = vld [vmem:[#allocation3 + $0x8] sm:$0xff] }
  0xc3   : > { %v463_v58 = vld [vmem:[#allocation3 + $0x2] sm:$0xff]  ;;  %413 = vmatmul.f32.gmra.mxu3 %v377_v57  ;;  %v464_v59 = vld [vmem:[#allocation3 + $0xa] sm:$0xff] }
  0xc4   : > { %498 = vmatmul.f32.vlgmr.msrb.gmra.mxu1 %v463_v58 }
  0xcb   : > { %501 = vmatmul.f32.vlgmr.msrb.gmra.mxu3 %v464_v59 }
 0x130   : > { %v455_v63 = vpop.f32.mrf.mxu0 }
 0x13e   : > { %v411_v61 = vpop.f32.mrf.mxu3  ;;  %v458_v7 = vpop.f32.mrf.mxu2 }
 0x13f   : > { %v417_v62 = vadd.f32 %v687_v60, %v411_v61 }
 0x141   : > { %v461_v0 = vadd.f32 %v455_v63, %v417_v62  ;;  %v499_v1 = vpop.f32.mrf.mxu1 }
 0x143   : > { %v505_v2 = vadd.f32 %v499_v1, %v461_v0 }
 0x145   : > { %v507_v3 = vadd.f32 %v505_v2, %v834_v28 }
 0x146   : > { %v414_v4 = vpop.f32.mrf.mxu3 }
 0x147   : > { %v509_v5 = vmax.f32 %v507_v3, 0.0  ;;  %v418_v6 = vadd.f32 %v687_v60, %v414_v4 }
 0x149   : > { %511 = vst [vmem:[%s224_s23] sm:$0xff] %v509_v5  ;;  %v462_v8 = vadd.f32 %v458_v7, %v418_v6 }
 0x14e   : > { %v502_v9 = vpop.f32.mrf.mxu3 }
 0x14f   : > { %v506_v10 = vadd.f32 %v502_v9, %v462_v8 }
 0x151   : > { %v508_v11 = vadd.f32 %v506_v10, %v836_v29 }
 0x153   : > { %v510_v12 = vmax.f32 %v508_v11, 0.0 }
 0x155   : > { %512 = vst [vmem:[%s224_s23 + $0x8] sm:$0xff] %v510_v12 }
 0x156 PF: > { %s15_s18 = sadd.s32 1, %s694_s18  }
 0x157   : > { %p12_p4 = scmp.ge.s32.totalorder %s15_s18, 4  }
 0x159   :  { %14 = sbr.rel (!%p12_p4) target bundleno = 1 (0x1), region = 74 }

</bundles_post_ra>
